<compile_context>
chip_gen: v7x
topology: tpu7x:2x2x1
jax: 0.10.0
libtpu: 0.0.40
codegen_flags: <defaults>
</compile_context>

<pallas_src>
import jax
import jax.numpy as jnp
import numpy as np
from jax import lax
from jax.experimental import pallas as pl
from jax.experimental.pallas import tpu as pltpu

HIDDEN = 40
LANE = 128
MAX_TILE_ROWS = 2048  # 2048 * 128 * 4 B = 1 MiB per f32 tile (in + out, double-buffered ~4 MiB)


def _round_up(a, b):
    return ((a + b - 1) // b) * b


def pinn_kernel(x_ref, w1_ref, b1_ref, w2_ref, b2_ref, o_ref):
    """Elementwise PINN forward on a lane-dense (tile_rows, 128) slab.

    out = b2 + sum_j w2[j] * tanh(x * w1[j] + b1[j])
    w1/b1/w2/b2 are small f32 arrays living in SMEM; scalars broadcast on the VPU.
    """
    x = x_ref[...]
    acc0 = jnp.full(x.shape, b2_ref[0], dtype=jnp.float32)

    def body(j, acc):
        return acc + w2_ref[j] * jnp.tanh(x * w1_ref[j] + b1_ref[j])

    o_ref[...] = lax.fori_loop(0, HIDDEN, body, acc0, unroll=True)


def pinn_forward(t, w1, b1, w2, b2, *, max_tile_rows=MAX_TILE_ROWS):
    """t: (N, 1) float32.  Returns (N, 1) float32, matching PyTorch PINN.forward."""
    N = t.shape[0]

    # Lane-dense slab layout: flatten t and view it as (rows, 128) with rows % 8 == 0.
    rows_needed = max(1, -(-N // LANE))
    tile_rows = min(max_tile_rows, _round_up(rows_needed, 8))
    total_rows = _round_up(rows_needed, tile_rows)
    n_slab = total_rows * LANE

    x_slab = (
        jnp.zeros((n_slab,), jnp.float32)
        .at[:N]
        .set(t.reshape(-1).astype(jnp.float32))
        .reshape(total_rows, LANE)
    )

    w1_v = w1.reshape(HIDDEN).astype(jnp.float32)
    b1_v = b1.reshape(HIDDEN).astype(jnp.float32)
    w2_v = w2.reshape(HIDDEN).astype(jnp.float32)
    b2_v = b2.reshape(1).astype(jnp.float32)

    smem_spec = pl.BlockSpec(memory_space=pltpu.MemorySpace.SMEM)

    out_slab = pl.pallas_call(
        pinn_kernel,
        out_shape=jax.ShapeDtypeStruct((total_rows, LANE), jnp.float32),
        grid=(total_rows // tile_rows,),
        in_specs=[
            pl.BlockSpec((tile_rows, LANE), lambda i: (i, 0)),
            smem_spec,  # w1
            smem_spec,  # b1
            smem_spec,  # w2
            smem_spec,  # b2
        ],
        out_specs=pl.BlockSpec((tile_rows, LANE), lambda i: (i, 0)),
        compiler_params=pltpu.CompilerParams(
            dimension_semantics=("parallel",),  # batch tiles are independent (v7x 2-TC shard)
        ),
    )(x_slab, w1_v, b1_v, w2_v, b2_v)

    return out_slab.reshape(-1)[:N].reshape(N, 1)


def init_params(key):
    """Deterministic PyTorch-style init: U(-1/sqrt(fan_in), 1/sqrt(fan_in))."""
    k1, k2, k3, k4 = jax.random.split(key, 4)
    bound1 = 1.0 / np.sqrt(1.0)
    bound2 = 1.0 / np.sqrt(float(HIDDEN))
    w1 = jax.random.uniform(k1, (1, HIDDEN), jnp.float32, -bound1, bound1)
    b1 = jax.random.uniform(k2, (HIDDEN,), jnp.float32, -bound1, bound1)
    w2 = jax.random.uniform(k3, (HIDDEN, 1), jnp.float32, -bound2, bound2)
    b2 = jax.random.uniform(k4, (1,), jnp.float32, -bound2, bound2)
    return w1, b1, w2, b2


if __name__ == "__main__":
    key = jax.random.PRNGKey(0)
    k_in, k_par = jax.random.split(key)

    N = 8  # small batch of time points t, shape (N, 1) as in PINN.forward
    t = jax.random.uniform(k_in, (N, 1), jnp.float32, 0.0, 1.0)
    w1, b1, w2, b2 = init_params(k_par)

    out = pinn_forward(t, w1, b1, w2, b2)
    out = jax.block_until_ready(out)

    # exact f32 elementwise reference of the same (1 -> 40 -> 1) MLP
    h = jnp.tanh(t * w1.reshape(1, HIDDEN) + b1.reshape(1, HIDDEN))
    ref = jnp.sum(h * w2.reshape(1, HIDDEN), axis=1, keepdims=True) + b2.reshape(1, 1)

    np.testing.assert_allclose(np.asarray(out), np.asarray(ref), rtol=1e-5, atol=1e-5)
    print("KERNEL_OK")
</pallas_src>

<mosaic_0001>
module attributes {stable_mosaic.version = 11 : i64} {
  func.func @pinn_kernel(%arg0: i32, %arg1: memref<8x128xf32, #tpu.memory_space<vmem>>, %arg2: memref<40xf32, #tpu.memory_space<smem>>, %arg3: memref<40xf32, #tpu.memory_space<smem>>, %arg4: memref<40xf32, #tpu.memory_space<smem>>, %arg5: memref<1xf32, #tpu.memory_space<smem>>, %arg6: memref<8x128xf32, #tpu.memory_space<vmem>>) attributes {dimension_semantics = [#tpu.dimension_semantics<parallel>], iteration_bounds = array<i64: 1>, scalar_prefetch = 0 : i64, scratch_operands = 0 : i64, tpu.core_type = #tpu.core_type<tc>, window_params = [{transform_indices = @transform_0, window_bounds = array<i64: 8, 128>}, {transform_indices = @transform_1, window_bounds = array<i64: 40>}, {transform_indices = @transform_2, window_bounds = array<i64: 40>}, {transform_indices = @transform_3, window_bounds = array<i64: 40>}, {transform_indices = @transform_4, window_bounds = array<i64: 1>}, {transform_indices = @transform_5, window_bounds = array<i64: 8, 128>}]} {
    %c0 = arith.constant 0 : index
    %c0_0 = arith.constant 0 : index
    %0 = vector.load %arg1[%c0, %c0_0] : memref<8x128xf32, #tpu.memory_space<vmem>>, vector<8x128xf32>
    %c0_1 = arith.constant 0 : index
    %1 = memref.load %arg5[%c0_1] : memref<1xf32, #tpu.memory_space<smem>>
    %2 = vector.broadcast %1 : f32 to vector<8x128xf32>
    %c0_i32 = arith.constant 0 : i32
    %3 = arith.index_cast %c0_i32 : i32 to index
    %4 = memref.load %arg4[%3] : memref<40xf32, #tpu.memory_space<smem>>
    %5 = arith.index_cast %c0_i32 : i32 to index
    %6 = memref.load %arg2[%5] : memref<40xf32, #tpu.memory_space<smem>>
    %7 = vector.broadcast %6 : f32 to vector<8x128xf32>
    %8 = arith.mulf %0, %7 : vector<8x128xf32>
    %9 = arith.index_cast %c0_i32 : i32 to index
    %10 = memref.load %arg3[%9] : memref<40xf32, #tpu.memory_space<smem>>
    %11 = vector.broadcast %10 : f32 to vector<8x128xf32>
    %12 = arith.addf %8, %11 : vector<8x128xf32>
    %13 = math.tanh %12 : vector<8x128xf32>
    %14 = vector.broadcast %4 : f32 to vector<8x128xf32>
    %15 = arith.mulf %14, %13 : vector<8x128xf32>
    %16 = arith.addf %2, %15 : vector<8x128xf32>
    %c1_i32 = arith.constant 1 : i32
    %17 = arith.index_cast %c1_i32 : i32 to index
    %18 = memref.load %arg4[%17] : memref<40xf32, #tpu.memory_space<smem>>
    %19 = arith.index_cast %c1_i32 : i32 to index
    %20 = memref.load %arg2[%19] : memref<40xf32, #tpu.memory_space<smem>>
    %21 = vector.broadcast %20 : f32 to vector<8x128xf32>
    %22 = arith.mulf %0, %21 : vector<8x128xf32>
    %23 = arith.index_cast %c1_i32 : i32 to index
    %24 = memref.load %arg3[%23] : memref<40xf32, #tpu.memory_space<smem>>
    %25 = vector.broadcast %24 : f32 to vector<8x128xf32>
    %26 = arith.addf %22, %25 : vector<8x128xf32>
    %27 = math.tanh %26 : vector<8x128xf32>
    %28 = vector.broadcast %18 : f32 to vector<8x128xf32>
    %29 = arith.mulf %28, %27 : vector<8x128xf32>
    %30 = arith.addf %16, %29 : vector<8x128xf32>
    %c2_i32 = arith.constant 2 : i32
    %31 = arith.index_cast %c2_i32 : i32 to index
    %32 = memref.load %arg4[%31] : memref<40xf32, #tpu.memory_space<smem>>
    %33 = arith.index_cast %c2_i32 : i32 to index
    %34 = memref.load %arg2[%33] : memref<40xf32, #tpu.memory_space<smem>>
    %35 = vector.broadcast %34 : f32 to vector<8x128xf32>
    %36 = arith.mulf %0, %35 : vector<8x128xf32>
    %37 = arith.index_cast %c2_i32 : i32 to index
    %38 = memref.load %arg3[%37] : memref<40xf32, #tpu.memory_space<smem>>
    %39 = vector.broadcast %38 : f32 to vector<8x128xf32>
    %40 = arith.addf %36, %39 : vector<8x128xf32>
    %41 = math.tanh %40 : vector<8x128xf32>
    %42 = vector.broadcast %32 : f32 to vector<8x128xf32>
    %43 = arith.mulf %42, %41 : vector<8x128xf32>
    %44 = arith.addf %30, %43 : vector<8x128xf32>
    %c3_i32 = arith.constant 3 : i32
    %45 = arith.index_cast %c3_i32 : i32 to index
    %46 = memref.load %arg4[%45] : memref<40xf32, #tpu.memory_space<smem>>
    %47 = arith.index_cast %c3_i32 : i32 to index
    %48 = memref.load %arg2[%47] : memref<40xf32, #tpu.memory_space<smem>>
    %49 = vector.broadcast %48 : f32 to vector<8x128xf32>
    %50 = arith.mulf %0, %49 : vector<8x128xf32>
    %51 = arith.index_cast %c3_i32 : i32 to index
    %52 = memref.load %arg3[%51] : memref<40xf32, #tpu.memory_space<smem>>
    %53 = vector.broadcast %52 : f32 to vector<8x128xf32>
    %54 = arith.addf %50, %53 : vector<8x128xf32>
    %55 = math.tanh %54 : vector<8x128xf32>
    %56 = vector.broadcast %46 : f32 to vector<8x128xf32>
    %57 = arith.mulf %56, %55 : vector<8x128xf32>
    %58 = arith.addf %44, %57 : vector<8x128xf32>
    %c4_i32 = arith.constant 4 : i32
    %59 = arith.index_cast %c4_i32 : i32 to index
    %60 = memref.load %arg4[%59] : memref<40xf32, #tpu.memory_space<smem>>
    %61 = arith.index_cast %c4_i32 : i32 to index
    %62 = memref.load %arg2[%61] : memref<40xf32, #tpu.memory_space<smem>>
    %63 = vector.broadcast %62 : f32 to vector<8x128xf32>
    %64 = arith.mulf %0, %63 : vector<8x128xf32>
    %65 = arith.index_cast %c4_i32 : i32 to index
    %66 = memref.load %arg3[%65] : memref<40xf32, #tpu.memory_space<smem>>
    %67 = vector.broadcast %66 : f32 to vector<8x128xf32>
    %68 = arith.addf %64, %67 : vector<8x128xf32>
    %69 = math.tanh %68 : vector<8x128xf32>
    %70 = vector.broadcast %60 : f32 to vector<8x128xf32>
    %71 = arith.mulf %70, %69 : vector<8x128xf32>
    %72 = arith.addf %58, %71 : vector<8x128xf32>
    %c5_i32 = arith.constant 5 : i32
    %73 = arith.index_cast %c5_i32 : i32 to index
    %74 = memref.load %arg4[%73] : memref<40xf32, #tpu.memory_space<smem>>
    %75 = arith.index_cast %c5_i32 : i32 to index
    %76 = memref.load %arg2[%75] : memref<40xf32, #tpu.memory_space<smem>>
    %77 = vector.broadcast %76 : f32 to vector<8x128xf32>
    %78 = arith.mulf %0, %77 : vector<8x128xf32>
    %79 = arith.index_cast %c5_i32 : i32 to index
    %80 = memref.load %arg3[%79] : memref<40xf32, #tpu.memory_space<smem>>
    %81 = vector.broadcast %80 : f32 to vector<8x128xf32>
    %82 = arith.addf %78, %81 : vector<8x128xf32>
    %83 = math.tanh %82 : vector<8x128xf32>
    %84 = vector.broadcast %74 : f32 to vector<8x128xf32>
    %85 = arith.mulf %84, %83 : vector<8x128xf32>
    %86 = arith.addf %72, %85 : vector<8x128xf32>
    %c6_i32 = arith.constant 6 : i32
    %87 = arith.index_cast %c6_i32 : i32 to index
    %88 = memref.load %arg4[%87] : memref<40xf32, #tpu.memory_space<smem>>
    %89 = arith.index_cast %c6_i32 : i32 to index
    %90 = memref.load %arg2[%89] : memref<40xf32, #tpu.memory_space<smem>>
    %91 = vector.broadcast %90 : f32 to vector<8x128xf32>
    %92 = arith.mulf %0, %91 : vector<8x128xf32>
    %93 = arith.index_cast %c6_i32 : i32 to index
    %94 = memref.load %arg3[%93] : memref<40xf32, #tpu.memory_space<smem>>
    %95 = vector.broadcast %94 : f32 to vector<8x128xf32>
    %96 = arith.addf %92, %95 : vector<8x128xf32>
    %97 = math.tanh %96 : vector<8x128xf32>
    %98 = vector.broadcast %88 : f32 to vector<8x128xf32>
    %99 = arith.mulf %98, %97 : vector<8x128xf32>
    %100 = arith.addf %86, %99 : vector<8x128xf32>
    %c7_i32 = arith.constant 7 : i32
    %101 = arith.index_cast %c7_i32 : i32 to index
    %102 = memref.load %arg4[%101] : memref<40xf32, #tpu.memory_space<smem>>
    %103 = arith.index_cast %c7_i32 : i32 to index
    %104 = memref.load %arg2[%103] : memref<40xf32, #tpu.memory_space<smem>>
    %105 = vector.broadcast %104 : f32 to vector<8x128xf32>
    %106 = arith.mulf %0, %105 : vector<8x128xf32>
    %107 = arith.index_cast %c7_i32 : i32 to index
    %108 = memref.load %arg3[%107] : memref<40xf32, #tpu.memory_space<smem>>
    %109 = vector.broadcast %108 : f32 to vector<8x128xf32>
    %110 = arith.addf %106, %109 : vector<8x128xf32>
    %111 = math.tanh %110 : vector<8x128xf32>
    %112 = vector.broadcast %102 : f32 to vector<8x128xf32>
    %113 = arith.mulf %112, %111 : vector<8x128xf32>
    %114 = arith.addf %100, %113 : vector<8x128xf32>
    %c8_i32 = arith.constant 8 : i32
    %115 = arith.index_cast %c8_i32 : i32 to index
    %116 = memref.load %arg4[%115] : memref<40xf32, #tpu.memory_space<smem>>
    %117 = arith.index_cast %c8_i32 : i32 to index
    %118 = memref.load %arg2[%117] : memref<40xf32, #tpu.memory_space<smem>>
    %119 = vector.broadcast %118 : f32 to vector<8x128xf32>
    %120 = arith.mulf %0, %119 : vector<8x128xf32>
    %121 = arith.index_cast %c8_i32 : i32 to index
    %122 = memref.load %arg3[%121] : memref<40xf32, #tpu.memory_space<smem>>
    %123 = vector.broadcast %122 : f32 to vector<8x128xf32>
    %124 = arith.addf %120, %123 : vector<8x128xf32>
    %125 = math.tanh %124 : vector<8x128xf32>
    %126 = vector.broadcast %116 : f32 to vector<8x128xf32>
    %127 = arith.mulf %126, %125 : vector<8x128xf32>
    %128 = arith.addf %114, %127 : vector<8x128xf32>
    %c9_i32 = arith.constant 9 : i32
    %129 = arith.index_cast %c9_i32 : i32 to index
    %130 = memref.load %arg4[%129] : memref<40xf32, #tpu.memory_space<smem>>
    %131 = arith.index_cast %c9_i32 : i32 to index
    %132 = memref.load %arg2[%131] : memref<40xf32, #tpu.memory_space<smem>>
    %133 = vector.broadcast %132 : f32 to vector<8x128xf32>
    %134 = arith.mulf %0, %133 : vector<8x128xf32>
    %135 = arith.index_cast %c9_i32 : i32 to index
    %136 = memref.load %arg3[%135] : memref<40xf32, #tpu.memory_space<smem>>
    %137 = vector.broadcast %136 : f32 to vector<8x128xf32>
    %138 = arith.addf %134, %137 : vector<8x128xf32>
    %139 = math.tanh %138 : vector<8x128xf32>
    %140 = vector.broadcast %130 : f32 to vector<8x128xf32>
    %141 = arith.mulf %140, %139 : vector<8x128xf32>
    %142 = arith.addf %128, %141 : vector<8x128xf32>
    %c10_i32 = arith.constant 10 : i32
    %143 = arith.index_cast %c10_i32 : i32 to index
    %144 = memref.load %arg4[%143] : memref<40xf32, #tpu.memory_space<smem>>
    %145 = arith.index_cast %c10_i32 : i32 to index
    %146 = memref.load %arg2[%145] : memref<40xf32, #tpu.memory_space<smem>>
    %147 = vector.broadcast %146 : f32 to vector<8x128xf32>
    %148 = arith.mulf %0, %147 : vector<8x128xf32>
    %149 = arith.index_cast %c10_i32 : i32 to index
    %150 = memref.load %arg3[%149] : memref<40xf32, #tpu.memory_space<smem>>
    %151 = vector.broadcast %150 : f32 to vector<8x128xf32>
    %152 = arith.addf %148, %151 : vector<8x128xf32>
    %153 = math.tanh %152 : vector<8x128xf32>
    %154 = vector.broadcast %144 : f32 to vector<8x128xf32>
    %155 = arith.mulf %154, %153 : vector<8x128xf32>
    %156 = arith.addf %142, %155 : vector<8x128xf32>
    %c11_i32 = arith.constant 11 : i32
    %157 = arith.index_cast %c11_i32 : i32 to index
    %158 = memref.load %arg4[%157] : memref<40xf32, #tpu.memory_space<smem>>
    %159 = arith.index_cast %c11_i32 : i32 to index
    %160 = memref.load %arg2[%159] : memref<40xf32, #tpu.memory_space<smem>>
    %161 = vector.broadcast %160 : f32 to vector<8x128xf32>
    %162 = arith.mulf %0, %161 : vector<8x128xf32>
    %163 = arith.index_cast %c11_i32 : i32 to index
    %164 = memref.load %arg3[%163] : memref<40xf32, #tpu.memory_space<smem>>
    %165 = vector.broadcast %164 : f32 to vector<8x128xf32>
    %166 = arith.addf %162, %165 : vector<8x128xf32>
    %167 = math.tanh %166 : vector<8x128xf32>
    %168 = vector.broadcast %158 : f32 to vector<8x128xf32>
    %169 = arith.mulf %168, %167 : vector<8x128xf32>
    %170 = arith.addf %156, %169 : vector<8x128xf32>
    %c12_i32 = arith.constant 12 : i32
    %171 = arith.index_cast %c12_i32 : i32 to index
    %172 = memref.load %arg4[%171] : memref<40xf32, #tpu.memory_space<smem>>
    %173 = arith.index_cast %c12_i32 : i32 to index
    %174 = memref.load %arg2[%173] : memref<40xf32, #tpu.memory_space<smem>>
    %175 = vector.broadcast %174 : f32 to vector<8x128xf32>
    %176 = arith.mulf %0, %175 : vector<8x128xf32>
    %177 = arith.index_cast %c12_i32 : i32 to index
    %178 = memref.load %arg3[%177] : memref<40xf32, #tpu.memory_space<smem>>
    %179 = vector.broadcast %178 : f32 to vector<8x128xf32>
    %180 = arith.addf %176, %179 : vector<8x128xf32>
    %181 = math.tanh %180 : vector<8x128xf32>
    %182 = vector.broadcast %172 : f32 to vector<8x128xf32>
    %183 = arith.mulf %182, %181 : vector<8x128xf32>
    %184 = arith.addf %170, %183 : vector<8x128xf32>
    %c13_i32 = arith.constant 13 : i32
    %185 = arith.index_cast %c13_i32 : i32 to index
    %186 = memref.load %arg4[%185] : memref<40xf32, #tpu.memory_space<smem>>
    %187 = arith.index_cast %c13_i32 : i32 to index
    %188 = memref.load %arg2[%187] : memref<40xf32, #tpu.memory_space<smem>>
    %189 = vector.broadcast %188 : f32 to vector<8x128xf32>
    %190 = arith.mulf %0, %189 : vector<8x128xf32>
    %191 = arith.index_cast %c13_i32 : i32 to index
    %192 = memref.load %arg3[%191] : memref<40xf32, #tpu.memory_space<smem>>
    %193 = vector.broadcast %192 : f32 to vector<8x128xf32>
    %194 = arith.addf %190, %193 : vector<8x128xf32>
    %195 = math.tanh %194 : vector<8x128xf32>
    %196 = vector.broadcast %186 : f32 to vector<8x128xf32>
    %197 = arith.mulf %196, %195 : vector<8x128xf32>
    %198 = arith.addf %184, %197 : vector<8x128xf32>
    %c14_i32 = arith.constant 14 : i32
    %199 = arith.index_cast %c14_i32 : i32 to index
    %200 = memref.load %arg4[%199] : memref<40xf32, #tpu.memory_space<smem>>
    %201 = arith.index_cast %c14_i32 : i32 to index
    %202 = memref.load %arg2[%201] : memref<40xf32, #tpu.memory_space<smem>>
    %203 = vector.broadcast %202 : f32 to vector<8x128xf32>
    %204 = arith.mulf %0, %203 : vector<8x128xf32>
    %205 = arith.index_cast %c14_i32 : i32 to index
    %206 = memref.load %arg3[%205] : memref<40xf32, #tpu.memory_space<smem>>
    %207 = vector.broadcast %206 : f32 to vector<8x128xf32>
    %208 = arith.addf %204, %207 : vector<8x128xf32>
    %209 = math.tanh %208 : vector<8x128xf32>
    %210 = vector.broadcast %200 : f32 to vector<8x128xf32>
    %211 = arith.mulf %210, %209 : vector<8x128xf32>
    %212 = arith.addf %198, %211 : vector<8x128xf32>
    %c15_i32 = arith.constant 15 : i32
    %213 = arith.index_cast %c15_i32 : i32 to index
    %214 = memref.load %arg4[%213] : memref<40xf32, #tpu.memory_space<smem>>
    %215 = arith.index_cast %c15_i32 : i32 to index
    %216 = memref.load %arg2[%215] : memref<40xf32, #tpu.memory_space<smem>>
    %217 = vector.broadcast %216 : f32 to vector<8x128xf32>
    %218 = arith.mulf %0, %217 : vector<8x128xf32>
    %219 = arith.index_cast %c15_i32 : i32 to index
    %220 = memref.load %arg3[%219] : memref<40xf32, #tpu.memory_space<smem>>
    %221 = vector.broadcast %220 : f32 to vector<8x128xf32>
    %222 = arith.addf %218, %221 : vector<8x128xf32>
    %223 = math.tanh %222 : vector<8x128xf32>
    %224 = vector.broadcast %214 : f32 to vector<8x128xf32>
    %225 = arith.mulf %224, %223 : vector<8x128xf32>
    %226 = arith.addf %212, %225 : vector<8x128xf32>
    %c16_i32 = arith.constant 16 : i32
    %227 = arith.index_cast %c16_i32 : i32 to index
    %228 = memref.load %arg4[%227] : memref<40xf32, #tpu.memory_space<smem>>
    %229 = arith.index_cast %c16_i32 : i32 to index
    %230 = memref.load %arg2[%229] : memref<40xf32, #tpu.memory_space<smem>>
    %231 = vector.broadcast %230 : f32 to vector<8x128xf32>
    %232 = arith.mulf %0, %231 : vector<8x128xf32>
    %233 = arith.index_cast %c16_i32 : i32 to index
    %234 = memref.load %arg3[%233] : memref<40xf32, #tpu.memory_space<smem>>
    %235 = vector.broadcast %234 : f32 to vector<8x128xf32>
    %236 = arith.addf %232, %235 : vector<8x128xf32>
    %237 = math.tanh %236 : vector<8x128xf32>
    %238 = vector.broadcast %228 : f32 to vector<8x128xf32>
    %239 = arith.mulf %238, %237 : vector<8x128xf32>
    %240 = arith.addf %226, %239 : vector<8x128xf32>
    %c17_i32 = arith.constant 17 : i32
    %241 = arith.index_cast %c17_i32 : i32 to index
    %242 = memref.load %arg4[%241] : memref<40xf32, #tpu.memory_space<smem>>
    %243 = arith.index_cast %c17_i32 : i32 to index
    %244 = memref.load %arg2[%243] : memref<40xf32, #tpu.memory_space<smem>>
    %245 = vector.broadcast %244 : f32 to vector<8x128xf32>
    %246 = arith.mulf %0, %245 : vector<8x128xf32>
    %247 = arith.index_cast %c17_i32 : i32 to index
    %248 = memref.load %arg3[%247] : memref<40xf32, #tpu.memory_space<smem>>
    %249 = vector.broadcast %248 : f32 to vector<8x128xf32>
    %250 = arith.addf %246, %249 : vector<8x128xf32>
    %251 = math.tanh %250 : vector<8x128xf32>
    %252 = vector.broadcast %242 : f32 to vector<8x128xf32>
    %253 = arith.mulf %252, %251 : vector<8x128xf32>
    %254 = arith.addf %240, %253 : vector<8x128xf32>
    %c18_i32 = arith.constant 18 : i32
    %255 = arith.index_cast %c18_i32 : i32 to index
    %256 = memref.load %arg4[%255] : memref<40xf32, #tpu.memory_space<smem>>
    %257 = arith.index_cast %c18_i32 : i32 to index
    %258 = memref.load %arg2[%257] : memref<40xf32, #tpu.memory_space<smem>>
    %259 = vector.broadcast %258 : f32 to vector<8x128xf32>
    %260 = arith.mulf %0, %259 : vector<8x128xf32>
    %261 = arith.index_cast %c18_i32 : i32 to index
    %262 = memref.load %arg3[%261] : memref<40xf32, #tpu.memory_space<smem>>
    %263 = vector.broadcast %262 : f32 to vector<8x128xf32>
    %264 = arith.addf %260, %263 : vector<8x128xf32>
    %265 = math.tanh %264 : vector<8x128xf32>
    %266 = vector.broadcast %256 : f32 to vector<8x128xf32>
    %267 = arith.mulf %266, %265 : vector<8x128xf32>
    %268 = arith.addf %254, %267 : vector<8x128xf32>
    %c19_i32 = arith.constant 19 : i32
    %269 = arith.index_cast %c19_i32 : i32 to index
    %270 = memref.load %arg4[%269] : memref<40xf32, #tpu.memory_space<smem>>
    %271 = arith.index_cast %c19_i32 : i32 to index
    %272 = memref.load %arg2[%271] : memref<40xf32, #tpu.memory_space<smem>>
    %273 = vector.broadcast %272 : f32 to vector<8x128xf32>
    %274 = arith.mulf %0, %273 : vector<8x128xf32>
    %275 = arith.index_cast %c19_i32 : i32 to index
    %276 = memref.load %arg3[%275] : memref<40xf32, #tpu.memory_space<smem>>
    %277 = vector.broadcast %276 : f32 to vector<8x128xf32>
    %278 = arith.addf %274, %277 : vector<8x128xf32>
    %279 = math.tanh %278 : vector<8x128xf32>
    %280 = vector.broadcast %270 : f32 to vector<8x128xf32>
    %281 = arith.mulf %280, %279 : vector<8x128xf32>
    %282 = arith.addf %268, %281 : vector<8x128xf32>
    %c20_i32 = arith.constant 20 : i32
    %283 = arith.index_cast %c20_i32 : i32 to index
    %284 = memref.load %arg4[%283] : memref<40xf32, #tpu.memory_space<smem>>
    %285 = arith.index_cast %c20_i32 : i32 to index
    %286 = memref.load %arg2[%285] : memref<40xf32, #tpu.memory_space<smem>>
    %287 = vector.broadcast %286 : f32 to vector<8x128xf32>
    %288 = arith.mulf %0, %287 : vector<8x128xf32>
    %289 = arith.index_cast %c20_i32 : i32 to index
    %290 = memref.load %arg3[%289] : memref<40xf32, #tpu.memory_space<smem>>
    %291 = vector.broadcast %290 : f32 to vector<8x128xf32>
    %292 = arith.addf %288, %291 : vector<8x128xf32>
    %293 = math.tanh %292 : vector<8x128xf32>
    %294 = vector.broadcast %284 : f32 to vector<8x128xf32>
    %295 = arith.mulf %294, %293 : vector<8x128xf32>
    %296 = arith.addf %282, %295 : vector<8x128xf32>
    %c21_i32 = arith.constant 21 : i32
    %297 = arith.index_cast %c21_i32 : i32 to index
    %298 = memref.load %arg4[%297] : memref<40xf32, #tpu.memory_space<smem>>
    %299 = arith.index_cast %c21_i32 : i32 to index
    %300 = memref.load %arg2[%299] : memref<40xf32, #tpu.memory_space<smem>>
    %301 = vector.broadcast %300 : f32 to vector<8x128xf32>
    %302 = arith.mulf %0, %301 : vector<8x128xf32>
    %303 = arith.index_cast %c21_i32 : i32 to index
    %304 = memref.load %arg3[%303] : memref<40xf32, #tpu.memory_space<smem>>
    %305 = vector.broadcast %304 : f32 to vector<8x128xf32>
    %306 = arith.addf %302, %305 : vector<8x128xf32>
    %307 = math.tanh %306 : vector<8x128xf32>
    %308 = vector.broadcast %298 : f32 to vector<8x128xf32>
    %309 = arith.mulf %308, %307 : vector<8x128xf32>
    %310 = arith.addf %296, %309 : vector<8x128xf32>
    %c22_i32 = arith.constant 22 : i32
    %311 = arith.index_cast %c22_i32 : i32 to index
    %312 = memref.load %arg4[%311] : memref<40xf32, #tpu.memory_space<smem>>
    %313 = arith.index_cast %c22_i32 : i32 to index
    %314 = memref.load %arg2[%313] : memref<40xf32, #tpu.memory_space<smem>>
    %315 = vector.broadcast %314 : f32 to vector<8x128xf32>
    %316 = arith.mulf %0, %315 : vector<8x128xf32>
    %317 = arith.index_cast %c22_i32 : i32 to index
    %318 = memref.load %arg3[%317] : memref<40xf32, #tpu.memory_space<smem>>
    %319 = vector.broadcast %318 : f32 to vector<8x128xf32>
    %320 = arith.addf %316, %319 : vector<8x128xf32>
    %321 = math.tanh %320 : vector<8x128xf32>
    %322 = vector.broadcast %312 : f32 to vector<8x128xf32>
    %323 = arith.mulf %322, %321 : vector<8x128xf32>
    %324 = arith.addf %310, %323 : vector<8x128xf32>
    %c23_i32 = arith.constant 23 : i32
    %325 = arith.index_cast %c23_i32 : i32 to index
    %326 = memref.load %arg4[%325] : memref<40xf32, #tpu.memory_space<smem>>
    %327 = arith.index_cast %c23_i32 : i32 to index
    %328 = memref.load %arg2[%327] : memref<40xf32, #tpu.memory_space<smem>>
    %329 = vector.broadcast %328 : f32 to vector<8x128xf32>
    %330 = arith.mulf %0, %329 : vector<8x128xf32>
    %331 = arith.index_cast %c23_i32 : i32 to index
    %332 = memref.load %arg3[%331] : memref<40xf32, #tpu.memory_space<smem>>
    %333 = vector.broadcast %332 : f32 to vector<8x128xf32>
    %334 = arith.addf %330, %333 : vector<8x128xf32>
    %335 = math.tanh %334 : vector<8x128xf32>
    %336 = vector.broadcast %326 : f32 to vector<8x128xf32>
    %337 = arith.mulf %336, %335 : vector<8x128xf32>
    %338 = arith.addf %324, %337 : vector<8x128xf32>
    %c24_i32 = arith.constant 24 : i32
    %339 = arith.index_cast %c24_i32 : i32 to index
    %340 = memref.load %arg4[%339] : memref<40xf32, #tpu.memory_space<smem>>
    %341 = arith.index_cast %c24_i32 : i32 to index
    %342 = memref.load %arg2[%341] : memref<40xf32, #tpu.memory_space<smem>>
    %343 = vector.broadcast %342 : f32 to vector<8x128xf32>
    %344 = arith.mulf %0, %343 : vector<8x128xf32>
    %345 = arith.index_cast %c24_i32 : i32 to index
    %346 = memref.load %arg3[%345] : memref<40xf32, #tpu.memory_space<smem>>
    %347 = vector.broadcast %346 : f32 to vector<8x128xf32>
    %348 = arith.addf %344, %347 : vector<8x128xf32>
    %349 = math.tanh %348 : vector<8x128xf32>
    %350 = vector.broadcast %340 : f32 to vector<8x128xf32>
    %351 = arith.mulf %350, %349 : vector<8x128xf32>
    %352 = arith.addf %338, %351 : vector<8x128xf32>
    %c25_i32 = arith.constant 25 : i32
    %353 = arith.index_cast %c25_i32 : i32 to index
    %354 = memref.load %arg4[%353] : memref<40xf32, #tpu.memory_space<smem>>
    %355 = arith.index_cast %c25_i32 : i32 to index
    %356 = memref.load %arg2[%355] : memref<40xf32, #tpu.memory_space<smem>>
    %357 = vector.broadcast %356 : f32 to vector<8x128xf32>
    %358 = arith.mulf %0, %357 : vector<8x128xf32>
    %359 = arith.index_cast %c25_i32 : i32 to index
    %360 = memref.load %arg3[%359] : memref<40xf32, #tpu.memory_space<smem>>
    %361 = vector.broadcast %360 : f32 to vector<8x128xf32>
    %362 = arith.addf %358, %361 : vector<8x128xf32>
    %363 = math.tanh %362 : vector<8x128xf32>
    %364 = vector.broadcast %354 : f32 to vector<8x128xf32>
    %365 = arith.mulf %364, %363 : vector<8x128xf32>
    %366 = arith.addf %352, %365 : vector<8x128xf32>
    %c26_i32 = arith.constant 26 : i32
    %367 = arith.index_cast %c26_i32 : i32 to index
    %368 = memref.load %arg4[%367] : memref<40xf32, #tpu.memory_space<smem>>
    %369 = arith.index_cast %c26_i32 : i32 to index
    %370 = memref.load %arg2[%369] : memref<40xf32, #tpu.memory_space<smem>>
    %371 = vector.broadcast %370 : f32 to vector<8x128xf32>
    %372 = arith.mulf %0, %371 : vector<8x128xf32>
    %373 = arith.index_cast %c26_i32 : i32 to index
    %374 = memref.load %arg3[%373] : memref<40xf32, #tpu.memory_space<smem>>
    %375 = vector.broadcast %374 : f32 to vector<8x128xf32>
    %376 = arith.addf %372, %375 : vector<8x128xf32>
    %377 = math.tanh %376 : vector<8x128xf32>
    %378 = vector.broadcast %368 : f32 to vector<8x128xf32>
    %379 = arith.mulf %378, %377 : vector<8x128xf32>
    %380 = arith.addf %366, %379 : vector<8x128xf32>
    %c27_i32 = arith.constant 27 : i32
    %381 = arith.index_cast %c27_i32 : i32 to index
    %382 = memref.load %arg4[%381] : memref<40xf32, #tpu.memory_space<smem>>
    %383 = arith.index_cast %c27_i32 : i32 to index
    %384 = memref.load %arg2[%383] : memref<40xf32, #tpu.memory_space<smem>>
    %385 = vector.broadcast %384 : f32 to vector<8x128xf32>
    %386 = arith.mulf %0, %385 : vector<8x128xf32>
    %387 = arith.index_cast %c27_i32 : i32 to index
    %388 = memref.load %arg3[%387] : memref<40xf32, #tpu.memory_space<smem>>
    %389 = vector.broadcast %388 : f32 to vector<8x128xf32>
    %390 = arith.addf %386, %389 : vector<8x128xf32>
    %391 = math.tanh %390 : vector<8x128xf32>
    %392 = vector.broadcast %382 : f32 to vector<8x128xf32>
    %393 = arith.mulf %392, %391 : vector<8x128xf32>
    %394 = arith.addf %380, %393 : vector<8x128xf32>
    %c28_i32 = arith.constant 28 : i32
    %395 = arith.index_cast %c28_i32 : i32 to index
    %396 = memref.load %arg4[%395] : memref<40xf32, #tpu.memory_space<smem>>
    %397 = arith.index_cast %c28_i32 : i32 to index
    %398 = memref.load %arg2[%397] : memref<40xf32, #tpu.memory_space<smem>>
    %399 = vector.broadcast %398 : f32 to vector<8x128xf32>
    %400 = arith.mulf %0, %399 : vector<8x128xf32>
    %401 = arith.index_cast %c28_i32 : i32 to index
    %402 = memref.load %arg3[%401] : memref<40xf32, #tpu.memory_space<smem>>
    %403 = vector.broadcast %402 : f32 to vector<8x128xf32>
    %404 = arith.addf %400, %403 : vector<8x128xf32>
    %405 = math.tanh %404 : vector<8x128xf32>
    %406 = vector.broadcast %396 : f32 to vector<8x128xf32>
    %407 = arith.mulf %406, %405 : vector<8x128xf32>
    %408 = arith.addf %394, %407 : vector<8x128xf32>
    %c29_i32 = arith.constant 29 : i32
    %409 = arith.index_cast %c29_i32 : i32 to index
    %410 = memref.load %arg4[%409] : memref<40xf32, #tpu.memory_space<smem>>
    %411 = arith.index_cast %c29_i32 : i32 to index
    %412 = memref.load %arg2[%411] : memref<40xf32, #tpu.memory_space<smem>>
    %413 = vector.broadcast %412 : f32 to vector<8x128xf32>
    %414 = arith.mulf %0, %413 : vector<8x128xf32>
    %415 = arith.index_cast %c29_i32 : i32 to index
    %416 = memref.load %arg3[%415] : memref<40xf32, #tpu.memory_space<smem>>
    %417 = vector.broadcast %416 : f32 to vector<8x128xf32>
    %418 = arith.addf %414, %417 : vector<8x128xf32>
    %419 = math.tanh %418 : vector<8x128xf32>
    %420 = vector.broadcast %410 : f32 to vector<8x128xf32>
    %421 = arith.mulf %420, %419 : vector<8x128xf32>
    %422 = arith.addf %408, %421 : vector<8x128xf32>
    %c30_i32 = arith.constant 30 : i32
    %423 = arith.index_cast %c30_i32 : i32 to index
    %424 = memref.load %arg4[%423] : memref<40xf32, #tpu.memory_space<smem>>
    %425 = arith.index_cast %c30_i32 : i32 to index
    %426 = memref.load %arg2[%425] : memref<40xf32, #tpu.memory_space<smem>>
    %427 = vector.broadcast %426 : f32 to vector<8x128xf32>
    %428 = arith.mulf %0, %427 : vector<8x128xf32>
    %429 = arith.index_cast %c30_i32 : i32 to index
    %430 = memref.load %arg3[%429] : memref<40xf32, #tpu.memory_space<smem>>
    %431 = vector.broadcast %430 : f32 to vector<8x128xf32>
    %432 = arith.addf %428, %431 : vector<8x128xf32>
    %433 = math.tanh %432 : vector<8x128xf32>
    %434 = vector.broadcast %424 : f32 to vector<8x128xf32>
    %435 = arith.mulf %434, %433 : vector<8x128xf32>
    %436 = arith.addf %422, %435 : vector<8x128xf32>
    %c31_i32 = arith.constant 31 : i32
    %437 = arith.index_cast %c31_i32 : i32 to index
    %438 = memref.load %arg4[%437] : memref<40xf32, #tpu.memory_space<smem>>
    %439 = arith.index_cast %c31_i32 : i32 to index
    %440 = memref.load %arg2[%439] : memref<40xf32, #tpu.memory_space<smem>>
    %441 = vector.broadcast %440 : f32 to vector<8x128xf32>
    %442 = arith.mulf %0, %441 : vector<8x128xf32>
    %443 = arith.index_cast %c31_i32 : i32 to index
    %444 = memref.load %arg3[%443] : memref<40xf32, #tpu.memory_space<smem>>
    %445 = vector.broadcast %444 : f32 to vector<8x128xf32>
    %446 = arith.addf %442, %445 : vector<8x128xf32>
    %447 = math.tanh %446 : vector<8x128xf32>
    %448 = vector.broadcast %438 : f32 to vector<8x128xf32>
    %449 = arith.mulf %448, %447 : vector<8x128xf32>
    %450 = arith.addf %436, %449 : vector<8x128xf32>
    %c32_i32 = arith.constant 32 : i32
    %451 = arith.index_cast %c32_i32 : i32 to index
    %452 = memref.load %arg4[%451] : memref<40xf32, #tpu.memory_space<smem>>
    %453 = arith.index_cast %c32_i32 : i32 to index
    %454 = memref.load %arg2[%453] : memref<40xf32, #tpu.memory_space<smem>>
    %455 = vector.broadcast %454 : f32 to vector<8x128xf32>
    %456 = arith.mulf %0, %455 : vector<8x128xf32>
    %457 = arith.index_cast %c32_i32 : i32 to index
    %458 = memref.load %arg3[%457] : memref<40xf32, #tpu.memory_space<smem>>
    %459 = vector.broadcast %458 : f32 to vector<8x128xf32>
    %460 = arith.addf %456, %459 : vector<8x128xf32>
    %461 = math.tanh %460 : vector<8x128xf32>
    %462 = vector.broadcast %452 : f32 to vector<8x128xf32>
    %463 = arith.mulf %462, %461 : vector<8x128xf32>
    %464 = arith.addf %450, %463 : vector<8x128xf32>
    %c33_i32 = arith.constant 33 : i32
    %465 = arith.index_cast %c33_i32 : i32 to index
    %466 = memref.load %arg4[%465] : memref<40xf32, #tpu.memory_space<smem>>
    %467 = arith.index_cast %c33_i32 : i32 to index
    %468 = memref.load %arg2[%467] : memref<40xf32, #tpu.memory_space<smem>>
    %469 = vector.broadcast %468 : f32 to vector<8x128xf32>
    %470 = arith.mulf %0, %469 : vector<8x128xf32>
    %471 = arith.index_cast %c33_i32 : i32 to index
    %472 = memref.load %arg3[%471] : memref<40xf32, #tpu.memory_space<smem>>
    %473 = vector.broadcast %472 : f32 to vector<8x128xf32>
    %474 = arith.addf %470, %473 : vector<8x128xf32>
    %475 = math.tanh %474 : vector<8x128xf32>
    %476 = vector.broadcast %466 : f32 to vector<8x128xf32>
    %477 = arith.mulf %476, %475 : vector<8x128xf32>
    %478 = arith.addf %464, %477 : vector<8x128xf32>
    %c34_i32 = arith.constant 34 : i32
    %479 = arith.index_cast %c34_i32 : i32 to index
    %480 = memref.load %arg4[%479] : memref<40xf32, #tpu.memory_space<smem>>
    %481 = arith.index_cast %c34_i32 : i32 to index
    %482 = memref.load %arg2[%481] : memref<40xf32, #tpu.memory_space<smem>>
    %483 = vector.broadcast %482 : f32 to vector<8x128xf32>
    %484 = arith.mulf %0, %483 : vector<8x128xf32>
    %485 = arith.index_cast %c34_i32 : i32 to index
    %486 = memref.load %arg3[%485] : memref<40xf32, #tpu.memory_space<smem>>
    %487 = vector.broadcast %486 : f32 to vector<8x128xf32>
    %488 = arith.addf %484, %487 : vector<8x128xf32>
    %489 = math.tanh %488 : vector<8x128xf32>
    %490 = vector.broadcast %480 : f32 to vector<8x128xf32>
    %491 = arith.mulf %490, %489 : vector<8x128xf32>
    %492 = arith.addf %478, %491 : vector<8x128xf32>
    %c35_i32 = arith.constant 35 : i32
    %493 = arith.index_cast %c35_i32 : i32 to index
    %494 = memref.load %arg4[%493] : memref<40xf32, #tpu.memory_space<smem>>
    %495 = arith.index_cast %c35_i32 : i32 to index
    %496 = memref.load %arg2[%495] : memref<40xf32, #tpu.memory_space<smem>>
    %497 = vector.broadcast %496 : f32 to vector<8x128xf32>
    %498 = arith.mulf %0, %497 : vector<8x128xf32>
    %499 = arith.index_cast %c35_i32 : i32 to index
    %500 = memref.load %arg3[%499] : memref<40xf32, #tpu.memory_space<smem>>
    %501 = vector.broadcast %500 : f32 to vector<8x128xf32>
    %502 = arith.addf %498, %501 : vector<8x128xf32>
    %503 = math.tanh %502 : vector<8x128xf32>
    %504 = vector.broadcast %494 : f32 to vector<8x128xf32>
    %505 = arith.mulf %504, %503 : vector<8x128xf32>
    %506 = arith.addf %492, %505 : vector<8x128xf32>
    %c36_i32 = arith.constant 36 : i32
    %507 = arith.index_cast %c36_i32 : i32 to index
    %508 = memref.load %arg4[%507] : memref<40xf32, #tpu.memory_space<smem>>
    %509 = arith.index_cast %c36_i32 : i32 to index
    %510 = memref.load %arg2[%509] : memref<40xf32, #tpu.memory_space<smem>>
    %511 = vector.broadcast %510 : f32 to vector<8x128xf32>
    %512 = arith.mulf %0, %511 : vector<8x128xf32>
    %513 = arith.index_cast %c36_i32 : i32 to index
    %514 = memref.load %arg3[%513] : memref<40xf32, #tpu.memory_space<smem>>
    %515 = vector.broadcast %514 : f32 to vector<8x128xf32>
    %516 = arith.addf %512, %515 : vector<8x128xf32>
    %517 = math.tanh %516 : vector<8x128xf32>
    %518 = vector.broadcast %508 : f32 to vector<8x128xf32>
    %519 = arith.mulf %518, %517 : vector<8x128xf32>
    %520 = arith.addf %506, %519 : vector<8x128xf32>
    %c37_i32 = arith.constant 37 : i32
    %521 = arith.index_cast %c37_i32 : i32 to index
    %522 = memref.load %arg4[%521] : memref<40xf32, #tpu.memory_space<smem>>
    %523 = arith.index_cast %c37_i32 : i32 to index
    %524 = memref.load %arg2[%523] : memref<40xf32, #tpu.memory_space<smem>>
    %525 = vector.broadcast %524 : f32 to vector<8x128xf32>
    %526 = arith.mulf %0, %525 : vector<8x128xf32>
    %527 = arith.index_cast %c37_i32 : i32 to index
    %528 = memref.load %arg3[%527] : memref<40xf32, #tpu.memory_space<smem>>
    %529 = vector.broadcast %528 : f32 to vector<8x128xf32>
    %530 = arith.addf %526, %529 : vector<8x128xf32>
    %531 = math.tanh %530 : vector<8x128xf32>
    %532 = vector.broadcast %522 : f32 to vector<8x128xf32>
    %533 = arith.mulf %532, %531 : vector<8x128xf32>
    %534 = arith.addf %520, %533 : vector<8x128xf32>
    %c38_i32 = arith.constant 38 : i32
    %535 = arith.index_cast %c38_i32 : i32 to index
    %536 = memref.load %arg4[%535] : memref<40xf32, #tpu.memory_space<smem>>
    %537 = arith.index_cast %c38_i32 : i32 to index
    %538 = memref.load %arg2[%537] : memref<40xf32, #tpu.memory_space<smem>>
    %539 = vector.broadcast %538 : f32 to vector<8x128xf32>
    %540 = arith.mulf %0, %539 : vector<8x128xf32>
    %541 = arith.index_cast %c38_i32 : i32 to index
    %542 = memref.load %arg3[%541] : memref<40xf32, #tpu.memory_space<smem>>
    %543 = vector.broadcast %542 : f32 to vector<8x128xf32>
    %544 = arith.addf %540, %543 : vector<8x128xf32>
    %545 = math.tanh %544 : vector<8x128xf32>
    %546 = vector.broadcast %536 : f32 to vector<8x128xf32>
    %547 = arith.mulf %546, %545 : vector<8x128xf32>
    %548 = arith.addf %534, %547 : vector<8x128xf32>
    %c39_i32 = arith.constant 39 : i32
    %549 = arith.index_cast %c39_i32 : i32 to index
    %550 = memref.load %arg4[%549] : memref<40xf32, #tpu.memory_space<smem>>
    %551 = arith.index_cast %c39_i32 : i32 to index
    %552 = memref.load %arg2[%551] : memref<40xf32, #tpu.memory_space<smem>>
    %553 = vector.broadcast %552 : f32 to vector<8x128xf32>
    %554 = arith.mulf %0, %553 : vector<8x128xf32>
    %555 = arith.index_cast %c39_i32 : i32 to index
    %556 = memref.load %arg3[%555] : memref<40xf32, #tpu.memory_space<smem>>
    %557 = vector.broadcast %556 : f32 to vector<8x128xf32>
    %558 = arith.addf %554, %557 : vector<8x128xf32>
    %559 = math.tanh %558 : vector<8x128xf32>
    %560 = vector.broadcast %550 : f32 to vector<8x128xf32>
    %561 = arith.mulf %560, %559 : vector<8x128xf32>
    %562 = arith.addf %548, %561 : vector<8x128xf32>
    %c40_i32 = arith.constant 40 : i32
    %c0_2 = arith.constant 0 : index
    %c0_3 = arith.constant 0 : index
    %563 = vector.load %arg6[%c0_2, %c0_3] : memref<8x128xf32, #tpu.memory_space<vmem>>, vector<8x128xf32>
    tpu.vector_store %arg6[%c0_2, %c0_3], %562 {strides = array<i32>} : memref<8x128xf32, #tpu.memory_space<vmem>>, vector<8x128xf32>,
    return
  }
  func.func @transform_0(%arg0: i32) -> (i32, i32) {
    %c0_i32 = arith.constant 0 : i32
    %c0_i32_0 = arith.constant 0 : i32
    return %arg0, %c0_i32 : i32, i32
  }
  func.func @transform_1(%arg0: i32) -> i32 {
    %c0_i32 = arith.constant 0 : i32
    %c0_i32_0 = arith.constant 0 : i32
    return %c0_i32 : i32
  }
  func.func @transform_2(%arg0: i32) -> i32 {
    %c0_i32 = arith.constant 0 : i32
    %c0_i32_0 = arith.constant 0 : i32
    return %c0_i32 : i32
  }
  func.func @transform_3(%arg0: i32) -> i32 {
    %c0_i32 = arith.constant 0 : i32
    %c0_i32_0 = arith.constant 0 : i32
    return %c0_i32 : i32
  }
  func.func @transform_4(%arg0: i32) -> i32 {
    %c0_i32 = arith.constant 0 : i32
    %c0_i32_0 = arith.constant 0 : i32
    return %c0_i32 : i32
  }
  func.func @transform_5(%arg0: i32) -> (i32, i32) {
    %c0_i32 = arith.constant 0 : i32
    %c0_i32_0 = arith.constant 0 : i32
    return %arg0, %c0_i32 : i32, i32
  }
}

</mosaic_0001>

<bundles_post_ra>
// kernel: tpu_custom_call.1
= control target key start
LH: loop header
LB: loop body
LE: loop exit
PB: predicated region body
PF: predicated region fallthrough
CT: control target
= control target key end

     0   :  { %11 = vsyncpa [#allocation4], 0  ;;  %s1261_s0 = inlined_call_operand.hbm [shape: f32[8,128], index: 0, kind: input, shape index: {}]   ;;  %s1262_s1 = inlined_call_operand.vmem [shape: f32[40], index: 1, kind: input, shape index: {}]   ;;  %s1263_s2 = inlined_call_operand.vmem [shape: f32[40], index: 2, kind: input, shape index: {}]   ;;  %s1264_s3 = inlined_call_operand.vmem [shape: f32[40], index: 3, kind: input, shape index: {}]   ;;  %s1265_s4 = inlined_call_operand.<no memory space> [shape: f32[1], index: 4, kind: input, shape index: {}]   ;;  %s1266_s5 = inlined_call_operand.hbm [shape: f32[8,128], index: 5, kind: output, shape index: {}]  }
   0x1   :  { %12 = vsyncpa [#allocation6], 0 }
   0x2   :  { %13 = vsyncpa [#allocation9], 0  ;;  %s41_s20 = sshll.u32 %s1263_s2, 4  ;;  %s42_s20 = int_to_ptr.vmem [resolvable:$true] %s41_s20 }
   0x3   :  { %14 = vsyncpa [#allocation5], 0  ;;  %s733_s21 = scalar_lea.vmem %s42_s20, 16  ;;  %p738_p1 = scmp.lt.s32.totalorder %s42_s20, %s42_s20 }
   0x4   :  { %p734_p0 = scmp.ne.s32.totalorder %s42_s20, %s733_s21  ;;  %p739_p2 = scmp.lt.s32.totalorder %s733_s21, %s733_s21 }
   0x6   :  { %p740_p3 = por %p739_p2, %p738_p1 }
   0x8   :  { %p741_p4 = pnand %p740_p3, %p734_p0 }
   0xa   :  { %744 = shalt.err (!%p741_p4)
}
   0xb   :  { %s821_s22 = smov [#allocation8]   ;;  %s822_s23 = smov [#allocation3]  }
   0xc   :  { %44 = dma.vmem_to_smem %s42_s20, 16, %s821_s22, [#allocation9]  }
   0xd   :  { %s21_s24 = sshll.u32 %s822_s23, 4  ;;  %s31_s27 = sshll.u32 %s1262_s1, 4  ;;  %s22_s24 = int_to_ptr.vmem [resolvable:$true] %s21_s24  ;;  %s32_s27 = int_to_ptr.vmem [resolvable:$true] %s31_s27 }
   0xe   :  { %s745_s29 = scalar_lea.hbm %s1261_s0, 128 }
   0xf   :  { %p746_p5 = scmp.ne.s32.totalorder %s1261_s0, %s745_s29  ;;  %p749_p6 = scmp.lt.u32.totalorder %s745_s29, %s1261_s0 }
  0x11   :  { %p751_p7 = pnand %p749_p6, %p746_p5 }
  0x13   :  { %754 = shalt.err (!%p751_p7)
}
  0x14   :  { %s755_s9 = scalar_lea.vmem %s22_s24, 128  ;;  %p760_p9 = scmp.lt.s32.totalorder %s22_s24, %s22_s24 }
  0x15   :  { %p756_p8 = scmp.ne.s32.totalorder %s22_s24, %s755_s9  ;;  %p761_p10 = scmp.lt.s32.totalorder %s755_s9, %s755_s9 }
  0x17   :  { %p762_p11 = por %p761_p10, %p760_p9 }
  0x19   :  { %p763_p12 = pnand %p762_p11, %p756_p8 }
  0x1b   :  { %766 = shalt.err (!%p763_p12)
}
  0x1c   :  { %24 = dma.hbm_to_vmem [thread:$0]  %s1261_s0, 128, %s22_s24, [#allocation4]  }
  0x1d   :  { %s51_s13 = sshll.u32 %s1264_s3, 4  ;;  %s767_s14 = scalar_lea.vmem %s32_s27, 16  ;;  %s52_s13 = int_to_ptr.vmem [resolvable:$true] %s51_s13 }
  0x1e   :  { %p768_p13 = scmp.ne.s32.totalorder %s32_s27, %s767_s14  ;;  %p772_p0 = scmp.lt.s32.totalorder %s32_s27, %s32_s27 }
  0x1f   :  { %p773_p1 = scmp.lt.s32.totalorder %s767_s14, %s767_s14 }
  0x21   :  { %p774_p2 = por %p773_p1, %p772_p0 }
  0x23   :  { %p775_p3 = pnand %p774_p2, %p768_p13 }
  0x25   :  { %778 = shalt.err (!%p775_p3)
}
  0x26   :  { %s823_s15 = smov [#allocation7]   ;;  %s779_s16 = scalar_lea.vmem %s52_s13, 16 }
  0x27   :  { %34 = dma.vmem_to_smem %s32_s27, 16, %s823_s15, [#allocation6]  }
  0x28   :  { %p780_p4 = scmp.ne.s32.totalorder %s52_s13, %s779_s16  ;;  %p784_p5 = scmp.lt.s32.totalorder %s52_s13, %s52_s13 }
  0x29   :  { %p785_p6 = scmp.lt.s32.totalorder %s779_s16, %s779_s16 }
  0x2b   :  { %p786_p7 = por %p785_p6, %p784_p5 }
  0x2d   :  { %p787_p8 = pnand %p786_p7, %p780_p4 }
  0x2f   :  { %790 = shalt.err (!%p787_p8)
}
  0x30   :  { %s824_s0 = smov [#allocation10]  }
  0x31   :  { %54 = dma.vmem_to_smem %s52_s13, 16, %s824_s0, [#allocation9]  }
  0x32   :  { %813 = dma.done.wait [#allocation4], 128  }
  0x33   :  { %814 = vsyncadd [#allocation4], 4294967168 }
  0x34   :  { %815 = dma.done.wait [#allocation6], 16  }
  0x35   :  { %816 = vsyncadd [#allocation6], 4294967280 }
  0x36   :  { %817 = dma.done.wait [#allocation9], 32  }
  0x37   :  { %818 = vsyncadd [#allocation9], 4294967264 }
  0x38   :  { %69 = sfence }
  0x39   :  { %s74_s3 = sld [smem:[#allocation7]]  ;;  %s532_s18 = sld [smem:[#allocation7 + $0x1]]  ;;  %v877_v0 = vld [vmem:[#allocation3] sm:$0xff]  ;;  %v72_v22 = vstv %s1265_s4 }
  0x3a   :  { %s77_s17 = sld [smem:[#allocation8]]  ;;  %s533_s19 = sld [smem:[#allocation8 + $0x1]] }
  0x3b   :  { %s535_s20 = sld [smem:[#allocation7 + $0x2]]  ;;  %s538_s22 = sld [smem:[#allocation7 + $0x3]] }
  0x3c   :  { %s536_s21 = sld [smem:[#allocation8 + $0x2]]  ;;  %s879_s23 = sld [smem:[#allocation8 + $0x3]] }
  0x3d   :  { %s541_s24 = sld [smem:[#allocation7 + $0x4]]  ;;  %s881_s25 = sld [smem:[#allocation10]] }
  0x3e   :  { %s884_s26 = sld [smem:[#allocation8 + $0x4]]  ;;  %s886_s27 = sld [smem:[#allocation7 + $0x5]] }
  0x3f   :  { %v75_v1 = vstv %s74_s3  ;;  %v86_v4 = vstv %s532_s18  ;;  %s888_s2 = sld [smem:[#allocation8 + $0x5]]  ;;  %s890_s28 = sld [smem:[#allocation10 + $0x1]] }
  0x40   :  { %v76_v2 = vmul.f32 %v75_v1, %v877_v0  ;;  %v78_v3 = vstv %s77_s17  ;;  %v89_v5 = vstv %s533_s19  ;;  %v87_v7 = vmul.f32 %v86_v4, %v877_v0  ;;  %s893_s29 = sld [smem:[#allocation7 + $0x6]]  ;;  %s895_s30 = sld [smem:[#allocation10 + $0x2]] }
  0x41   :  { %v97_v8 = vstv %s535_s20  ;;  %s898_s6 = sld [smem:[#allocation8 + $0x6]]  ;;  %v108_v12 = vstv %s538_s22  ;;  %s901_s7 = sld [smem:[#allocation7 + $0x7]] }
  0x42   :  { %v79_v6 = vadd.f32 %v78_v3, %v76_v2  ;;  %v98_v9 = vmul.f32 %v97_v8, %v877_v0  ;;  %v100_v10 = vstv %s536_s21  ;;  %v90_v11 = vadd.f32 %v89_v5, %v87_v7  ;;  %s903_s8 = sld [smem:[#allocation8 + $0x7]]  ;;  %s906_s9 = sld [smem:[#allocation7 + $0x8]] }
  0x43   :  { %v111_v13 = vstv %s879_s23  ;;  %v109_v15 = vmul.f32 %v108_v12, %v877_v0  ;;  %v119_v16 = vstv %s541_s24  ;;  %s908_s1 = sld [smem:[#allocation10 + $0x3]]  ;;  %s912_s10 = sld [smem:[#allocation8 + $0x8]]  ;;  %v81_v26 = vstv %s881_s25 }
  0x44   :  { %653 = vtanh.f32 %v79_v6  ;;  %v101_v14 = vadd.f32 %v100_v10, %v98_v9  ;;  %v120_v17 = vmul.f32 %v119_v16, %v877_v0  ;;  %v122_v18 = vstv %s884_s26  ;;  %s916_s11 = sld [smem:[#allocation7 + $0x9]]  ;;  %s925_s15 = sld [smem:[#allocation7 + $0xa]] }
  0x45   :  { %655 = vtanh.f32 %v90_v11  ;;  %v112_v19 = vadd.f32 %v111_v13, %v109_v15  ;;  %v130_v20 = vstv %s886_s27  ;;  %v133_v21 = vstv %s888_s2  ;;  %s918_s12 = sld [smem:[#allocation8 + $0x9]]  ;;  %s928_s16 = sld [smem:[#allocation10 + $0x4]] }
  0x46   :  { %657 = vtanh.f32 %v101_v14  ;;  %v123_v23 = vadd.f32 %v122_v18, %v120_v17  ;;  %v131_v24 = vmul.f32 %v130_v20, %v877_v0  ;;  %v141_v25 = vstv %s893_s29  ;;  %s932_s0 = sld [smem:[#allocation8 + $0xa]]  ;;  %s936_s4 = sld [smem:[#allocation7 + $0xb]] }
  0x47   :  { %659 = vtanh.f32 %v112_v19  ;;  %v142_v27 = vmul.f32 %v141_v25, %v877_v0  ;;  %v144_v28 = vstv %s898_s6  ;;  %v152_v30 = vstv %s901_s7  ;;  %s938_s3 = sld [smem:[#allocation8 + $0xb]]  ;;  %s941_s17 = sld [smem:[#allocation10 + $0x5]] }
  0x48   :  { %661 = vtanh.f32 %v123_v23  ;;  %v134_v29 = vadd.f32 %v133_v21, %v131_v24  ;;  %v155_v31 = vstv %s903_s8  ;;  %v92_v32 = vstv %s890_s28  ;;  %s945_s18 = sld [smem:[#allocation7 + $0xc]]  ;;  %s952_s20 = sld [smem:[#allocation10 + $0x6]] }
  0x49   :  { %v145_v33 = vadd.f32 %v144_v28, %v142_v27  ;;  %v153_v34 = vmul.f32 %v152_v30, %v877_v0  ;;  %v163_v35 = vstv %s906_s9  ;;  %v103_v36 = vstv %s895_s30  ;;  %s950_s19 = sld [smem:[#allocation8 + $0xc]]  ;;  %s956_s21 = sld [smem:[#allocation7 + $0xd]] }
  0x4a   :  { %663 = vtanh.f32 %v134_v29  ;;  %v164_v37 = vmul.f32 %v163_v35, %v877_v0  ;;  %v166_v38 = vstv %s912_s10  ;;  %v174_v40 = vstv %s916_s11  ;;  %s961_s22 = sld [smem:[#allocation8 + $0xd]]  ;;  %s963_s23 = sld [smem:[#allocation7 + $0xe]] }
  0x4b   :  { %665 = vtanh.f32 %v145_v33  ;;  %v156_v39 = vadd.f32 %v155_v31, %v153_v34  ;;  %v177_v41 = vstv %s918_s12  ;;  %v114_v43 = vstv %s908_s1  ;;  %s965_s24 = sld [smem:[#allocation10 + $0x7]]  ;;  %s971_s25 = sld [smem:[#allocation8 + $0xe]] }
  0x4c   :  { %v167_v44 = vadd.f32 %v166_v38, %v164_v37  ;;  %v175_v45 = vmul.f32 %v174_v40, %v877_v0  ;;  %v185_v46 = vstv %s925_s15  ;;  %v188_v49 = vstv %s932_s0  ;;  %s974_s26 = sld [smem:[#allocation7 + $0xf]]  ;;  %s979_s2 = sld [smem:[#allocation10 + $0x8]] }
  0x4d   :  { %667 = vtanh.f32 %v156_v39  ;;  %v186_v48 = vmul.f32 %v185_v46, %v877_v0  ;;  %v196_v52 = vstv %s936_s4  ;;  %v199_v53 = vstv %s938_s3  ;;  %s976_s27 = sld [smem:[#allocation8 + $0xf]]  ;;  %s983_s28 = sld [smem:[#allocation10 + $0x9]] }
  0x4e   :  { %v654_v42 = vpop.eup %653  ;;  %669 = vtanh.f32 %v167_v44  ;;  %v178_v51 = vadd.f32 %v177_v41, %v175_v45  ;;  %v197_v58 = vmul.f32 %v196_v52, %v877_v0  ;;  %v125_v60 = vstv %s928_s16  ;;  %s986_s29 = sld [smem:[#allocation7 + $0x10]]  ;;  %s993_s6 = sld [smem:[#allocation7 + $0x11]] }
  0x4f   :  { %v82_v47 = vmul.f32 %v654_v42, %v81_v26  ;;  %v656_v50 = vpop.eup %655  ;;  %v189_v57 = vadd.f32 %v188_v49, %v186_v48  ;;  %v207_v61 = vstv %s945_s18  ;;  %v136_v1 = vstv %s941_s17  ;;  %s990_s30 = sld [smem:[#allocation8 + $0x10]]  ;;  %s995_s7 = sld [smem:[#allocation8 + $0x11]] }
  0x50   :  { %v658_v54 = vpop.eup %657  ;;  %v93_v56 = vmul.f32 %v656_v50, %v92_v32  ;;  %671 = vtanh.f32 %v178_v51  ;;  %v200_v2 = vadd.f32 %v199_v53, %v197_v58  ;;  %v208_v3 = vmul.f32 %v207_v61, %v877_v0  ;;  %s997_s8 = sld [smem:[#allocation10 + $0xa]]  ;;  %s1008_s10 = sld [smem:[#allocation10 + $0xb]] }
  0x51   :  { %v83_v55 = vadd.f32 %v82_v47, %v72_v22  ;;  %v104_v59 = vmul.f32 %v658_v54, %v103_v36  ;;  %v660_v62 = vpop.eup %659  ;;  %673 = vtanh.f32 %v189_v57  ;;  %v210_v6 = vstv %s950_s19  ;;  %s1004_s9 = sld [smem:[#allocation7 + $0x12]]  ;;  %s1013_s11 = sld [smem:[#allocation7 + $0x13]] }
  0x52   :  { %v662_v4 = vpop.eup %661  ;;  %v115_v5 = vmul.f32 %v660_v62, %v114_v43  ;;  %v218_v7 = vstv %s956_s21  ;;  %v147_v10 = vstv %s952_s20  ;;  %v211_v11 = vadd.f32 %v210_v6, %v208_v3  ;;  %s1006_s1 = sld [smem:[#allocation8 + $0x12]]  ;;  %s1015_s12 = sld [smem:[#allocation8 + $0x13]] }
  0x53   :  { %v94_v63 = vadd.f32 %v93_v56, %v83_v55  ;;  %v126_v9 = vmul.f32 %v662_v4, %v125_v60  ;;  %675 = vtanh.f32 %v200_v2  ;;  %v219_v13 = vmul.f32 %v218_v7, %v877_v0  ;;  %s1018_s13 = sld [smem:[#allocation10 + $0xc]]  ;;  %s1027_s16 = sld [smem:[#allocation10 + $0xd]] }
  0x54   :  { %v664_v12 = vpop.eup %663  ;;  %v221_v14 = vstv %s961_s22  ;;  %v229_v15 = vstv %s963_s23  ;;  %v158_v19 = vstv %s965_s24  ;;  %677 = vtanh.f32 %v211_v11  ;;  %s1023_s14 = sld [smem:[#allocation7 + $0x14]]  ;;  %s1033_s0 = sld [smem:[#allocation7 + $0x15]] }
  0x55   :  { %v105_v8 = vadd.f32 %v104_v59, %v94_v63  ;;  %v666_v16 = vpop.eup %665  ;;  %v137_v18 = vmul.f32 %v664_v12, %v136_v1  ;;  %v230_v20 = vmul.f32 %v229_v15, %v877_v0  ;;  %v222_v22 = vadd.f32 %v221_v14, %v219_v13  ;;  %s1025_s15 = sld [smem:[#allocation8 + $0x14]]  ;;  %s1035_s4 = sld [smem:[#allocation8 + $0x15]] }
  0x56   :  { %v148_v21 = vmul.f32 %v666_v16, %v147_v10  ;;  %v232_v23 = vstv %s971_s25  ;;  %v240_v27 = vstv %s974_s26  ;;  %v243_v28 = vstv %s976_s27  ;;  %s1038_s3 = sld [smem:[#allocation10 + $0xe]]  ;;  %s1048_s19 = sld [smem:[#allocation10 + $0xf]] }
  0x57   :  { %v116_v17 = vadd.f32 %v115_v5, %v105_v8  ;;  %v668_v24 = vpop.eup %667  ;;  %v233_v26 = vadd.f32 %v232_v23, %v230_v20  ;;  %v169_v30 = vstv %s979_s2  ;;  %679 = vtanh.f32 %v222_v22  ;;  %s1043_s17 = sld [smem:[#allocation7 + $0x16]]  ;;  %s1053_s20 = sld [smem:[#allocation7 + $0x17]] }
  0x58   :  { %v670_v29 = vpop.eup %669  ;;  %v241_v31 = vmul.f32 %v240_v27, %v877_v0  ;;  %v159_v33 = vmul.f32 %v668_v24, %v158_v19  ;;  %v180_v34 = vstv %s983_s28  ;;  %v251_v35 = vstv %s986_s29  ;;  %s1045_s18 = sld [smem:[#allocation8 + $0x16]]  ;;  %s1055_s21 = sld [smem:[#allocation8 + $0x17]] }
  0x59   :  { %v127_v25 = vadd.f32 %v126_v9, %v116_v17  ;;  %681 = vtanh.f32 %v233_v26  ;;  %v252_v38 = vmul.f32 %v251_v35, %v877_v0  ;;  %v254_v39 = vstv %s990_s30  ;;  %s1058_s22 = sld [smem:[#allocation10 + $0x10]]  ;;  %s1068_s25 = sld [smem:[#allocation10 + $0x11]] }
  0x5a   :  { %v672_v36 = vpop.eup %671  ;;  %v244_v37 = vadd.f32 %v243_v28, %v241_v31  ;;  %v170_v41 = vmul.f32 %v670_v29, %v169_v30  ;;  %v262_v42 = vstv %s993_s6  ;;  %v265_v43 = vstv %s995_s7  ;;  %s1063_s23 = sld [smem:[#allocation7 + $0x18]]  ;;  %s1073_s26 = sld [smem:[#allocation7 + $0x19]] }
  0x5b   :  { %v138_v32 = vadd.f32 %v137_v18, %v127_v25  ;;  %v674_v44 = vpop.eup %673  ;;  %v191_v45 = vstv %s997_s8  ;;  %v255_v46 = vadd.f32 %v254_v39, %v252_v38  ;;  %v263_v47 = vmul.f32 %v262_v42, %v877_v0  ;;  %s1065_s24 = sld [smem:[#allocation8 + $0x18]]  ;;  %s1075_s27 = sld [smem:[#allocation8 + $0x19]] }
  0x5c   :  { %683 = vtanh.f32 %v244_v37  ;;  %v181_v49 = vmul.f32 %v672_v36, %v180_v34  ;;  %v273_v50 = vstv %s1004_s9  ;;  %v276_v51 = vstv %s1006_s1  ;;  %s1078_s2 = sld [smem:[#allocation10 + $0x12]]  ;;  %s1088_s30 = sld [smem:[#allocation10 + $0x13]] }
  0x5d   :  { %v149_v40 = vadd.f32 %v148_v21, %v138_v32  ;;  %v676_v52 = vpop.eup %675  ;;  %v202_v53 = vstv %s1008_s10  ;;  %685 = vtanh.f32 %v255_v46  ;;  %v266_v54 = vadd.f32 %v265_v43, %v263_v47  ;;  %s1083_s28 = sld [smem:[#allocation7 + $0x1a]]  ;;  %s1093_s6 = sld [smem:[#allocation7 + $0x1b]] }
  0x5e   :  { %v274_v55 = vmul.f32 %v273_v50, %v877_v0  ;;  %v192_v57 = vmul.f32 %v674_v44, %v191_v45  ;;  %v284_v58 = vstv %s1013_s11  ;;  %v287_v59 = vstv %s1015_s12  ;;  %v678_v60 = vpop.eup %677  ;;  %s1085_s29 = sld [smem:[#allocation8 + $0x1a]]  ;;  %s1095_s7 = sld [smem:[#allocation8 + $0x1b]] }
  0x5f   :  { %v160_v48 = vadd.f32 %v159_v33, %v149_v40  ;;  %v213_v61 = vstv %s1018_s13  ;;  %687 = vtanh.f32 %v266_v54  ;;  %v285_v63 = vmul.f32 %v284_v58, %v877_v0  ;;  %s1098_s8 = sld [smem:[#allocation10 + $0x14]]  ;;  %s1108_s10 = sld [smem:[#allocation10 + $0x15]] }
  0x60   :  { %v277_v62 = vadd.f32 %v276_v51, %v274_v55  ;;  %v203_v2 = vmul.f32 %v676_v52, %v202_v53  ;;  %v295_v3 = vstv %s1023_s14  ;;  %v298_v4 = vstv %s1025_s15  ;;  %s1103_s9 = sld [smem:[#allocation7 + $0x1c]]  ;;  %s1113_s11 = sld [smem:[#allocation7 + $0x1d]] }
  0x61   :  { %v171_v56 = vadd.f32 %v170_v41, %v160_v48  ;;  %v680_v5 = vpop.eup %679  ;;  %v224_v6 = vstv %s1027_s16  ;;  %v288_v7 = vadd.f32 %v287_v59, %v285_v63  ;;  %v296_v8 = vmul.f32 %v295_v3, %v877_v0  ;;  %s1105_s1 = sld [smem:[#allocation8 + $0x1c]]  ;;  %s1115_s12 = sld [smem:[#allocation8 + $0x1d]] }
  0x62   :  { %689 = vtanh.f32 %v277_v62  ;;  %v214_v10 = vmul.f32 %v678_v60, %v213_v61  ;;  %v306_v11 = vstv %s1033_s0  ;;  %v309_v12 = vstv %s1035_s4  ;;  %s1118_s13 = sld [smem:[#allocation10 + $0x16]]  ;;  %s1128_s16 = sld [smem:[#allocation10 + $0x17]] }
  0x63   :  { %v182_v1 = vadd.f32 %v181_v49, %v171_v56  ;;  %v682_v13 = vpop.eup %681  ;;  %v235_v14 = vstv %s1038_s3  ;;  %691 = vtanh.f32 %v288_v7  ;;  %v299_v15 = vadd.f32 %v298_v4, %v296_v8  ;;  %s1123_s14 = sld [smem:[#allocation7 + $0x1e]]  ;;  %s1133_s0 = sld [smem:[#allocation7 + $0x1f]] }
  0x64   :  { %v307_v16 = vmul.f32 %v306_v11, %v877_v0  ;;  %v225_v18 = vmul.f32 %v680_v5, %v224_v6  ;;  %v317_v19 = vstv %s1043_s17  ;;  %v320_v20 = vstv %s1045_s18  ;;  %s1125_s15 = sld [smem:[#allocation8 + $0x1e]]  ;;  %s1135_s4 = sld [smem:[#allocation8 + $0x1f]] }
  0x65   :  { %v193_v9 = vadd.f32 %v192_v57, %v182_v1  ;;  %v246_v22 = vstv %s1048_s19  ;;  %693 = vtanh.f32 %v299_v15  ;;  %v318_v24 = vmul.f32 %v317_v19, %v877_v0  ;;  %s1138_s3 = sld [smem:[#allocation10 + $0x18]]  ;;  %s1148_s19 = sld [smem:[#allocation10 + $0x19]] }
  0x66   :  { %v684_v21 = vpop.eup %683  ;;  %v310_v23 = vadd.f32 %v309_v12, %v307_v16  ;;  %v236_v26 = vmul.f32 %v682_v13, %v235_v14  ;;  %v328_v27 = vstv %s1053_s20  ;;  %v331_v28 = vstv %s1055_s21  ;;  %s1143_s17 = sld [smem:[#allocation7 + $0x20]]  ;;  %s1153_s20 = sld [smem:[#allocation7 + $0x21]] }
  0x67   :  { %v204_v17 = vadd.f32 %v203_v2, %v193_v9  ;;  %v686_v29 = vpop.eup %685  ;;  %v257_v30 = vstv %s1058_s22  ;;  %v321_v31 = vadd.f32 %v320_v20, %v318_v24  ;;  %v329_v32 = vmul.f32 %v328_v27, %v877_v0  ;;  %s1145_s18 = sld [smem:[#allocation8 + $0x20]]  ;;  %s1155_s21 = sld [smem:[#allocation8 + $0x21]] }
  0x68   :  { %695 = vtanh.f32 %v310_v23  ;;  %v247_v34 = vmul.f32 %v684_v21, %v246_v22  ;;  %v339_v35 = vstv %s1063_s23  ;;  %v342_v36 = vstv %s1065_s24  ;;  %s1158_s22 = sld [smem:[#allocation10 + $0x1a]] }
  0x69   :  { %v215_v25 = vadd.f32 %v214_v10, %v204_v17  ;;  %v688_v37 = vpop.eup %687  ;;  %v268_v38 = vstv %s1068_s25  ;;  %697 = vtanh.f32 %v321_v31  ;;  %v332_v39 = vadd.f32 %v331_v28, %v329_v32  ;;  %s1163_s23 = sld [smem:[#allocation7 + $0x22]]  ;;  %s1168_s25 = sld [smem:[#allocation10 + $0x1b]] }
  0x6a   :  { %v340_v40 = vmul.f32 %v339_v35, %v877_v0  ;;  %v258_v42 = vmul.f32 %v686_v29, %v257_v30  ;;  %v350_v43 = vstv %s1073_s26  ;;  %v353_v44 = vstv %s1075_s27  ;;  %s1165_s24 = sld [smem:[#allocation8 + $0x22]]  ;;  %s1173_s26 = sld [smem:[#allocation7 + $0x23]] }
  0x6b   :  { %v226_v33 = vadd.f32 %v225_v18, %v215_v25  ;;  %v279_v46 = vstv %s1078_s2  ;;  %699 = vtanh.f32 %v332_v39  ;;  %v351_v48 = vmul.f32 %v350_v43, %v877_v0  ;;  %s1175_s27 = sld [smem:[#allocation8 + $0x23]]  ;;  %s1178_s2 = sld [smem:[#allocation10 + $0x1c]] }
  0x6c   :  { %v690_v45 = vpop.eup %689  ;;  %v343_v47 = vadd.f32 %v342_v36, %v340_v40  ;;  %v269_v50 = vmul.f32 %v688_v37, %v268_v38  ;;  %v361_v51 = vstv %s1083_s28  ;;  %v364_v52 = vstv %s1085_s29  ;;  %s1183_s28 = sld [smem:[#allocation7 + $0x24]] }
  0x6d   :  { %v237_v41 = vadd.f32 %v236_v26, %v226_v33  ;;  %v692_v53 = vpop.eup %691  ;;  %v290_v54 = vstv %s1088_s30  ;;  %v354_v55 = vadd.f32 %v353_v44, %v351_v48  ;;  %v362_v56 = vmul.f32 %v361_v51, %v877_v0  ;;  %s1185_s29 = sld [smem:[#allocation8 + $0x24]]  ;;  %s1188_s30 = sld [smem:[#allocation10 + $0x1d]] }
  0x6e   :  { %701 = vtanh.f32 %v343_v47  ;;  %v280_v58 = vmul.f32 %v690_v45, %v279_v46  ;;  %v372_v59 = vstv %s1093_s6  ;;  %v375_v60 = vstv %s1095_s7  ;;  %s1193_s6 = sld [smem:[#allocation7 + $0x25]] }
  0x6f   :  { %v248_v49 = vadd.f32 %v247_v34, %v237_v41  ;;  %v694_v61 = vpop.eup %693  ;;  %v301_v62 = vstv %s1098_s8  ;;  %703 = vtanh.f32 %v354_v55  ;;  %v365_v63 = vadd.f32 %v364_v52, %v362_v56  ;;  %s1195_s7 = sld [smem:[#allocation8 + $0x25]]  ;;  %s1198_s8 = sld [smem:[#allocation10 + $0x1e]] }
  0x70   :  { %v373_v1 = vmul.f32 %v372_v59, %v877_v0  ;;  %v291_v3 = vmul.f32 %v692_v53, %v290_v54  ;;  %v383_v4 = vstv %s1103_s9  ;;  %v386_v5 = vstv %s1105_s1  ;;  %s1203_s9 = sld [smem:[#allocation7 + $0x26]] }
  0x71   :  { %v259_v57 = vadd.f32 %v258_v42, %v248_v49  ;;  %v312_v7 = vstv %s1108_s10  ;;  %705 = vtanh.f32 %v365_v63  ;;  %v384_v9 = vmul.f32 %v383_v4, %v877_v0  ;;  %s1205_s1 = sld [smem:[#allocation8 + $0x26]]  ;;  %s1208_s10 = sld [smem:[#allocation10 + $0x1f]] }
  0x72   :  { %v696_v6 = vpop.eup %695  ;;  %v376_v8 = vadd.f32 %v375_v60, %v373_v1  ;;  %v302_v11 = vmul.f32 %v694_v61, %v301_v62  ;;  %v394_v12 = vstv %s1113_s11  ;;  %v397_v13 = vstv %s1115_s12  ;;  %s1213_s11 = sld [smem:[#allocation7 + $0x27]] }
  0x73   :  { %v270_v2 = vadd.f32 %v269_v50, %v259_v57  ;;  %v698_v14 = vpop.eup %697  ;;  %v323_v15 = vstv %s1118_s13  ;;  %v387_v16 = vadd.f32 %v386_v5, %v384_v9  ;;  %v395_v17 = vmul.f32 %v394_v12, %v877_v0  ;;  %s1215_s12 = sld [smem:[#allocation8 + $0x27]]  ;;  %s1218_s13 = sld [smem:[#allocation10 + $0x20]] }
  0x74   :  { %707 = vtanh.f32 %v376_v8  ;;  %v313_v19 = vmul.f32 %v696_v6, %v312_v7  ;;  %v405_v20 = vstv %s1123_s14  ;;  %v408_v21 = vstv %s1125_s15  ;;  %s1224_s14 = sld [smem:[#allocation10 + $0x21]]  ;;  %s1230_s15 = sld [smem:[#allocation10 + $0x22]] }
  0x75   :  { %v281_v10 = vadd.f32 %v280_v58, %v270_v2  ;;  %v700_v22 = vpop.eup %699  ;;  %v334_v23 = vstv %s1128_s16  ;;  %709 = vtanh.f32 %v387_v16  ;;  %v398_v24 = vadd.f32 %v397_v13, %v395_v17  ;;  %s1236_s16 = sld [smem:[#allocation10 + $0x23]] }
  0x76   :  { %v406_v25 = vmul.f32 %v405_v20, %v877_v0  ;;  %v324_v27 = vmul.f32 %v698_v14, %v323_v15  ;;  %v416_v28 = vstv %s1133_s0  ;;  %v419_v29 = vstv %s1135_s4  ;;  %s1242_s0 = sld [smem:[#allocation10 + $0x24]]  ;;  %s639_s4 = sld [smem:[#allocation10 + $0x25]] }
  0x77   :  { %v292_v18 = vadd.f32 %v291_v3, %v281_v10  ;;  %v345_v31 = vstv %s1138_s3  ;;  %711 = vtanh.f32 %v398_v24  ;;  %v417_v33 = vmul.f32 %v416_v28, %v877_v0  ;;  %s642_s3 = sld [smem:[#allocation10 + $0x26]] }
  0x78   :  { %v702_v30 = vpop.eup %701  ;;  %v409_v32 = vadd.f32 %v408_v21, %v406_v25  ;;  %v335_v35 = vmul.f32 %v700_v22, %v334_v23  ;;  %v427_v36 = vstv %s1143_s17  ;;  %v430_v37 = vstv %s1145_s18  ;;  %s645_s17 = sld [smem:[#allocation10 + $0x27]]  ;;  %s825_s18 = smov [#allocation11]  }
  0x79   :  { %v303_v26 = vadd.f32 %v302_v11, %v292_v18  ;;  %v704_v38 = vpop.eup %703  ;;  %v356_v39 = vstv %s1148_s19  ;;  %v420_v40 = vadd.f32 %v419_v29, %v417_v33  ;;  %v428_v41 = vmul.f32 %v427_v36, %v877_v0  ;;  %s520_s19 = sshll.u32 %s825_s18, 4  ;;  %s521_s19 = int_to_ptr.vmem [resolvable:$true] %s520_s19 }
  0x7a   :  { %713 = vtanh.f32 %v409_v32  ;;  %v346_v43 = vmul.f32 %v702_v30, %v345_v31  ;;  %v438_v44 = vstv %s1153_s20  ;;  %v441_v45 = vstv %s1155_s21  ;;  %s791_s20 = scalar_lea.vmem %s521_s19, 128  ;;  %p796_p10 = scmp.lt.s32.totalorder %s521_s19, %s521_s19 }
  0x7b   :  { %v314_v34 = vadd.f32 %v313_v19, %v303_v26  ;;  %v706_v46 = vpop.eup %705  ;;  %v367_v47 = vstv %s1158_s22  ;;  %715 = vtanh.f32 %v420_v40  ;;  %v431_v48 = vadd.f32 %v430_v37, %v428_v41  ;;  %p792_p9 = scmp.ne.s32.totalorder %s521_s19, %s791_s20  ;;  %p797_p11 = scmp.lt.s32.totalorder %s791_s20, %s791_s20 }
  0x7c   :  { %v439_v49 = vmul.f32 %v438_v44, %v877_v0  ;;  %v357_v51 = vmul.f32 %v704_v38, %v356_v39  ;;  %v449_v52 = vstv %s1163_s23  ;;  %v452_v53 = vstv %s1165_s24 }
  0x7d   :  { %v325_v42 = vadd.f32 %v324_v27, %v314_v34  ;;  %v378_v55 = vstv %s1168_s25  ;;  %717 = vtanh.f32 %v431_v48  ;;  %v450_v57 = vmul.f32 %v449_v52, %v877_v0  ;;  %p798_p12 = por %p797_p11, %p796_p10 }
  0x7e   :  { %v708_v54 = vpop.eup %707  ;;  %v442_v56 = vadd.f32 %v441_v45, %v439_v49  ;;  %v368_v59 = vmul.f32 %v706_v46, %v367_v47  ;;  %v460_v60 = vstv %s1173_s26  ;;  %v463_v61 = vstv %s1175_s27 }
  0x7f   :  { %v336_v50 = vadd.f32 %v335_v35, %v325_v42  ;;  %v710_v62 = vpop.eup %709  ;;  %v389_v63 = vstv %s1178_s2  ;;  %v453_v1 = vadd.f32 %v452_v53, %v450_v57  ;;  %v461_v2 = vmul.f32 %v460_v60, %v877_v0  ;;  %p799_p13 = pnand %p798_p12, %p792_p9 }
  0x80   :  { %719 = vtanh.f32 %v442_v56  ;;  %v379_v4 = vmul.f32 %v708_v54, %v378_v55  ;;  %v471_v5 = vstv %s1183_s28  ;;  %v474_v6 = vstv %s1185_s29 }
  0x81   :  { %v347_v58 = vadd.f32 %v346_v43, %v336_v50  ;;  %v712_v7 = vpop.eup %711  ;;  %v400_v8 = vstv %s1188_s30  ;;  %721 = vtanh.f32 %v453_v1  ;;  %v464_v9 = vadd.f32 %v463_v61, %v461_v2 }
  0x82   :  { %v472_v10 = vmul.f32 %v471_v5, %v877_v0  ;;  %v390_v12 = vmul.f32 %v710_v62, %v389_v63  ;;  %v482_v13 = vstv %s1193_s6  ;;  %v485_v14 = vstv %s1195_s7 }
  0x83   :  { %v358_v3 = vadd.f32 %v357_v51, %v347_v58  ;;  %v411_v16 = vstv %s1198_s8  ;;  %723 = vtanh.f32 %v464_v9  ;;  %v483_v18 = vmul.f32 %v482_v13, %v877_v0 }
  0x84   :  { %v714_v15 = vpop.eup %713  ;;  %v475_v17 = vadd.f32 %v474_v6, %v472_v10  ;;  %v401_v20 = vmul.f32 %v712_v7, %v400_v8  ;;  %v493_v21 = vstv %s1203_s9  ;;  %v496_v22 = vstv %s1205_s1 }
  0x85   :  { %v369_v11 = vadd.f32 %v368_v59, %v358_v3  ;;  %v716_v23 = vpop.eup %715  ;;  %v422_v24 = vstv %s1208_s10  ;;  %v486_v25 = vadd.f32 %v485_v14, %v483_v18  ;;  %v494_v26 = vmul.f32 %v493_v21, %v877_v0 }
  0x86   :  { %725 = vtanh.f32 %v475_v17  ;;  %v412_v28 = vmul.f32 %v714_v15, %v411_v16  ;;  %v504_v29 = vstv %s1213_s11  ;;  %v507_v30 = vstv %s1215_s12 }
  0x87   :  { %v380_v19 = vadd.f32 %v379_v4, %v369_v11  ;;  %v718_v31 = vpop.eup %717  ;;  %v433_v32 = vstv %s1218_s13  ;;  %727 = vtanh.f32 %v486_v25  ;;  %v497_v33 = vadd.f32 %v496_v22, %v494_v26 }
  0x88   :  { %v505_v34 = vmul.f32 %v504_v29, %v877_v0  ;;  %v423_v36 = vmul.f32 %v716_v23, %v422_v24  ;;  %v444_v38 = vstv %s1224_s14  ;;  %v434_v41 = vmul.f32 %v718_v31, %v433_v32 }
  0x89   :  { %v391_v27 = vadd.f32 %v390_v12, %v380_v19  ;;  %729 = vtanh.f32 %v497_v33  ;;  %v455_v43 = vstv %s1230_s15  ;;  %v466_v47 = vstv %s1236_s16 }
  0x8a   :  { %v720_v37 = vpop.eup %719  ;;  %v508_v39 = vadd.f32 %v507_v30, %v505_v34  ;;  %v477_v50 = vstv %s1242_s0  ;;  %v488_v54 = vstv %s639_s4  ;;  %v499_v58 = vstv %s642_s3 }
  0x8b   :  { %v402_v35 = vadd.f32 %v401_v20, %v391_v27  ;;  %v722_v42 = vpop.eup %721  ;;  %v445_v45 = vmul.f32 %v720_v37, %v444_v38  ;;  %v510_v62 = vstv %s645_s17 }
  0x8c   :  { %731 = vtanh.f32 %v508_v39  ;;  %v456_v48 = vmul.f32 %v722_v42, %v455_v43 }
  0x8d   :  { %v413_v40 = vadd.f32 %v412_v28, %v402_v35  ;;  %v724_v46 = vpop.eup %723 }
  0x8e   :  { %v467_v52 = vmul.f32 %v724_v46, %v466_v47 }
  0x8f   :  { %v424_v44 = vadd.f32 %v423_v36, %v413_v40 }
  0x90   :  { %v726_v49 = vpop.eup %725 }
  0x91   :  { %v435_v0 = vadd.f32 %v434_v41, %v424_v44  ;;  %v728_v53 = vpop.eup %727  ;;  %v478_v56 = vmul.f32 %v726_v49, %v477_v50 }
  0x92   :  { %v489_v60 = vmul.f32 %v728_v53, %v488_v54 }
  0x93   :  { %v446_v51 = vadd.f32 %v445_v45, %v435_v0  ;;  %v730_v57 = vpop.eup %729 }
  0x94   :  { %v500_v1 = vmul.f32 %v730_v57, %v499_v58 }
  0x95   :  { %v457_v55 = vadd.f32 %v456_v48, %v446_v51 }
  0x96   :  { %v732_v61 = vpop.eup %731 }
  0x97   :  { %v468_v59 = vadd.f32 %v467_v52, %v457_v55  ;;  %v511_v3 = vmul.f32 %v732_v61, %v510_v62 }
  0x99   :  { %v479_v63 = vadd.f32 %v478_v56, %v468_v59 }
  0x9b   :  { %v490_v2 = vadd.f32 %v489_v60, %v479_v63 }
  0x9d   :  { %v501_v4 = vadd.f32 %v500_v1, %v490_v2 }
  0x9f   :  { %v512_v5 = vadd.f32 %v511_v3, %v501_v4 }
  0xa1   :  { %513 = vst [vmem:[#allocation11] sm:$0xff] %v512_v5 }
  0xa2   :  { %802 = shalt.err (!%p799_p13)
}
  0xa3   :  { %s803_s23 = scalar_lea.hbm %s1266_s5, 128 }
  0xa4   :  { %p804_p0 = scmp.ne.s32.totalorder %s1266_s5, %s803_s23  ;;  %p807_p1 = scmp.lt.u32.totalorder %s803_s23, %s1266_s5 }
  0xa6   :  { %p809_p2 = pnand %p807_p1, %p804_p0 }
  0xa8   :  { %812 = shalt.err (!%p809_p2)
}
  0xa9   :  { %523 = dma.vmem_to_hbm [thread:$0]  %s521_s19, 128, %s1266_s5, [#allocation5]  }
  0xaa   :  { %819 = dma.done.wait [#allocation5], 128  }
  0xab   :  { %820 = vsyncadd [#allocation5], 4294967168 }
  0xac   :  { %527 = vsyncpa [#allocation4], 1 }
  0xad   :  { %528 = vsyncpa [#allocation5], 1 }
  0xae   :  { %529 = vsyncpa [#allocation6], 1 }
  0xaf   :  { %530 = vsyncpa [#allocation9], 1 }

</bundles_post_ra>
